<compile_context>
chip_gen: v7x
topology: tpu7x:2x2x1
jax: 0.10.0
libtpu: 0.0.40
codegen_flags: <defaults>
</compile_context>

<pallas_src>
import functools
import math

import jax
import jax.numpy as jnp
from jax.experimental import pallas as pl
from jax.experimental.pallas import tpu as pltpu


def _round_up(x, m):
    return (x + m - 1) // m * m


def _label_smoothing_kernel(x_ref, t_ref, acc_ref, *, base, one_minus_eps,
                            ignore_index):
    """Accumulate sum over rows of  w[i,:] * x[i,:]  (ignored rows -> 0).

    w is (1-eps) at the target column and `base` everywhere else; the
    ignore-column zeroing and the constant y*log(y) entropy term are applied
    analytically in the wrapper.  acc_ref is an (8, C_pad) f32 accumulator
    resident across the trailing ('arbitrary') grid axis.
    """
    j = pl.program_id(1)                         # reduction axis (batch blocks)

    @pl.when(j == 0)
    def _():
        acc_ref[...] = jnp.zeros_like(acc_ref)

    x = x_ref[...].astype(jnp.float32)           # (TB, Cp) log-probabilities
    t = t_ref[...]                               # (TB, 1) int32 targets
    tb, cp = x.shape

    col = jax.lax.broadcasted_iota(jnp.int32, (tb, cp), 1)
    valid = t != ignore_index                    # (TB, 1): rows that count
    xm = jnp.where(valid, x, 0.0)                # zero ignored / padded rows
    w = jnp.where(col == t, jnp.float32(one_minus_eps), jnp.float32(base))
    contrib = w * xm                             # (TB, Cp)

    # Fold the row axis in groups of 8 -> pure vreg adds (no cross-lane XLU
    # work per step); the final scalar reduce happens once in the wrapper.
    partial = jnp.sum(contrib.reshape(tb // 8, 8, cp), axis=0)   # (8, Cp)
    acc_ref[...] += partial


def label_smoothing_loss(inputs, target, *, n_classes, epsilon=0.0,
                         ignore_index=-1, reduction='mean',
                         block_b=None, target_tile_bytes=2 * 1024 * 1024):
    assert reduction in ('sum', 'mean')
    b, c = inputs.shape
    assert c == n_classes

    less_val = 1 if ignore_index < 0 else 2
    assert n_classes > less_val
    base = float(epsilon) / (n_classes - less_val)
    one_minus_eps = 1.0 - float(epsilon)

    # Per-valid-row constant entropy sum_j y*log(y)  (0*log(0) := 0).
    entropy = 0.0
    if one_minus_eps > 0.0:
        entropy += one_minus_eps * math.log(one_minus_eps)
    if epsilon > 0.0:
        entropy += float(epsilon) * math.log(base)

    # ---- layout: pad classes to 128 lanes, pick a large row tile -----------
    c_pad = _round_up(c, 128)
    itemsize = jnp.dtype(inputs.dtype).itemsize
    if block_b is None:
        block_b = (target_tile_bytes // (c_pad * itemsize)) // 16 * 16
        block_b = max(16, block_b)
        block_b = min(block_b, _round_up(b, 16))
    assert block_b % 16 == 0                     # bf16 needs >=16 sublanes

    n_blocks = pl.cdiv(b, block_b)
    n_par = 2 if n_blocks >= 2 else 1            # megacore split (v7x)
    blocks_per_par = pl.cdiv(n_blocks, n_par)
    b_pad = n_par * blocks_per_par * block_b

    x = inputs                                   # stream native dtype (no cast)
    if c_pad != c or b_pad != b:
        x = jnp.pad(x, ((0, b_pad - b), (0, c_pad - c)))
    t2d = target.reshape(b, 1).astype(jnp.int32)
    if b_pad != b:
        # Padded rows get target == ignore_index so they are masked in-kernel.
        t2d = jnp.pad(t2d, ((0, b_pad - b), (0, 0)),
                      constant_values=ignore_index)

    kernel = functools.partial(_label_smoothing_kernel, base=base,
                               one_minus_eps=one_minus_eps,
                               ignore_index=ignore_index)

    x_tile_bytes = block_b * c_pad * itemsize
    # double-buffered x tile + target tile + accumulator block + headroom,
    # clamped to stay inside every generation's scoped VMEM (v5e 16 MiB
    # default raised explicitly; v7x 64 MiB physical respected).
    vmem_limit = int(min(max(4 * x_tile_bytes + (4 << 20), 16 << 20), 48 << 20))

    acc = pl.pallas_call(
        kernel,
        out_shape=jax.ShapeDtypeStruct((n_par * 8, c_pad), jnp.float32),
        grid_spec=pltpu.PrefetchScalarGridSpec(
            num_scalar_prefetch=0,
            grid=(n_par, blocks_per_par),
            in_specs=[
                pl.BlockSpec((block_b, c_pad),
                             lambda p, j: (p * blocks_per_par + j, 0)),
                pl.BlockSpec((block_b, 1),
                             lambda p, j: (p * blocks_per_par + j, 0)),
            ],
            out_specs=pl.BlockSpec((8, c_pad), lambda p, j: (p, 0)),
        ),
        compiler_params=pltpu.CompilerParams(
            dimension_semantics=("parallel", "arbitrary"),
            vmem_limit_bytes=vmem_limit),
    )(x, t2d)

    # ---- tiny final reductions + constant terms in plain JAX ---------------
    weighted = jnp.sum(acc)                      # sum_i sum_j w_ij * x_ij
    if ignore_index >= 0:
        # y[ignore_index] is 0, so remove that column's base-weighted part.
        weighted = weighted - jnp.sum(acc[:, ignore_index])
    n_valid = jnp.sum(target != ignore_index).astype(jnp.float32)
    loss = n_valid * entropy - weighted          # KLDivLoss(reduction='sum')
    if reduction == 'mean':
        # Matches PyTorch: divides by the valid-row count (0/0 if all ignored).
        loss = loss / n_valid
    return loss


def _reference_loss(inputs, target, *, n_classes, epsilon, ignore_index,
                    reduction):
    """Pure-JAX port of the PyTorch forward, for correctness checking."""
    b = target.shape[0]
    less_val = 1 if ignore_index < 0 else 2
    one_hot = jnp.full((n_classes,), epsilon / (n_classes - less_val),
                       jnp.float32)
    if ignore_index >= 0:
        one_hot = one_hot.at[ignore_index].set(0.0)
    dist = jnp.tile(one_hot[None, :], (b, 1))
    dist = dist.at[jnp.arange(b), target].set(1.0 - epsilon)
    ignore = (target == ignore_index)[:, None]
    dist = jnp.where(ignore, 0.0, dist)
    safe = jnp.where(dist > 0.0, dist, 1.0)
    loss = jnp.sum(jnp.where(dist > 0.0, dist * (jnp.log(safe) - inputs), 0.0))
    if reduction == 'mean':
        loss = loss / (b - jnp.sum(ignore))
    return loss


if __name__ == "__main__":
    key = jax.random.PRNGKey(0)

    # --- case 1: ignore_index >= 0, mean reduction ---------------------------
    B, C = 16, 32
    EPS, IGNORE, RED = 0.1, 0, 'mean'
    k1, k2 = jax.random.split(key)
    logits = jax.random.normal(k1, (B, C), jnp.float32)
    log_probs = jax.nn.log_softmax(logits, axis=-1)
    target = jax.random.randint(k2, (B,), 0, C, jnp.int32)
    target = target.at[3].set(IGNORE).at[11].set(IGNORE)

    loss = label_smoothing_loss(log_probs, target, n_classes=C, epsilon=EPS,
                                ignore_index=IGNORE, reduction=RED)
    loss = jax.block_until_ready(loss)
    ref = _reference_loss(log_probs, target, n_classes=C, epsilon=EPS,
                          ignore_index=IGNORE, reduction=RED)
    assert jnp.allclose(loss, ref, rtol=1e-5, atol=1e-5), (loss, ref)

    # --- case 2: ignore_index < 0, sum reduction, ragged batch (padding) -----
    B2, C2 = 24, 32
    EPS2, IGNORE2, RED2 = 0.2, -1, 'sum'
    k3, k4 = jax.random.split(k2)
    logits2 = jax.random.normal(k3, (B2, C2), jnp.float32)
    log_probs2 = jax.nn.log_softmax(logits2, axis=-1)
    target2 = jax.random.randint(k4, (B2,), 0, C2, jnp.int32)

    loss2 = label_smoothing_loss(log_probs2, target2, n_classes=C2,
                                 epsilon=EPS2, ignore_index=IGNORE2,
                                 reduction=RED2)
    loss2 = jax.block_until_ready(loss2)
    ref2 = _reference_loss(log_probs2, target2, n_classes=C2, epsilon=EPS2,
                           ignore_index=IGNORE2, reduction=RED2)
    assert jnp.allclose(loss2, ref2, rtol=1e-5, atol=1e-5), (loss2, ref2)

    print("KERNEL_OK")
</pallas_src>

<mosaic_0001>
module attributes {stable_mosaic.version = 11 : i64} {
  func.func @_label_smoothing_kernel(%arg0: i32, %arg1: i32, %arg2: memref<16x128xf32, #tpu.memory_space<vmem>>, %arg3: memref<16x1xi32, #tpu.memory_space<vmem>>, %arg4: memref<8x128xf32, #tpu.memory_space<vmem>>) attributes {dimension_semantics = [#tpu.dimension_semantics<parallel>, #tpu.dimension_semantics<arbitrary>], iteration_bounds = array<i64: 1, 1>, scalar_prefetch = 0 : i64, scratch_operands = 0 : i64, tpu.core_type = #tpu.core_type<tc>, window_params = [{transform_indices = @transform_0, window_bounds = array<i64: 16, 128>}, {transform_indices = @transform_1, window_bounds = array<i64: 16, 1>}, {transform_indices = @transform_2, window_bounds = array<i64: 8, 128>}]} {
    %c0_i32 = arith.constant 0 : i32
    %0 = arith.cmpi eq, %arg1, %c0_i32 : i32
    %1 = arith.extui %0 : i1 to i32
    %c0_i32_0 = arith.constant 0 : i32
    %2 = arith.cmpi ne, %1, %c0_i32_0 : i32
    scf.if %2 {
      %cst_12 = arith.constant 0.000000e+00 : f32
      %23 = vector.broadcast %cst_12 : f32 to vector<8x128xf32>
      %c0_13 = arith.constant 0 : index
      %c0_14 = arith.constant 0 : index
      %24 = vector.load %arg4[%c0_13, %c0_14] : memref<8x128xf32, #tpu.memory_space<vmem>>, vector<8x128xf32>
      tpu.vector_store %arg4[%c0_13, %c0_14], %23 {strides = array<i32>} : memref<8x128xf32, #tpu.memory_space<vmem>>, vector<8x128xf32>,
    } else {
    }
    %c0 = arith.constant 0 : index
    %c0_1 = arith.constant 0 : index
    %3 = vector.load %arg2[%c0, %c0_1] : memref<16x128xf32, #tpu.memory_space<vmem>>, vector<16x128xf32>
    %c0_2 = arith.constant 0 : index
    %c0_3 = arith.constant 0 : index
    %4 = vector.load %arg3[%c0_2, %c0_3] : memref<16x1xi32, #tpu.memory_space<vmem>>, vector<16x1xi32>
    %5 = tpu.iota {dimensions = array<i32: 1>} : vector<16x128xi32>
    %c0_i32_4 = arith.constant 0 : i32
    %6 = vector.broadcast %c0_i32_4 : i32 to vector<16x1xi32>
    %7 = arith.cmpi ne, %4, %6 : vector<16x1xi32>
    %cst = arith.constant 0.000000e+00 : f32
    %8 = vector.shape_cast %7 : vector<16x1xi1> to vector<16x1xi1>
    %9 = vector.broadcast %8 : vector<16x1xi1> to vector<16x128xi1>
    %10 = vector.broadcast %cst : f32 to vector<16x128xf32>
    %11 = arith.select %9, %3, %10 : vector<16x128xi1>, vector<16x128xf32>
    %12 = vector.broadcast %4 : vector<16x1xi32> to vector<16x128xi32>
    %13 = arith.cmpi eq, %5, %12 : vector<16x128xi32>
    %cst_5 = arith.constant 0.899999976 : f32
    %cst_6 = arith.constant 0.00333333341 : f32
    %14 = vector.broadcast %cst_5 : f32 to vector<16x128xf32>
    %15 = vector.broadcast %cst_6 : f32 to vector<16x128xf32>
    %16 = arith.select %13, %14, %15 : vector<16x128xi1>, vector<16x128xf32>
    %17 = arith.mulf %16, %11 : vector<16x128xf32>
    %18 = vector.shape_cast %17 : vector<16x128xf32> to vector<2x8x128xf32>
    %cst_7 = arith.constant dense<0.000000e+00> : vector<8x128xf32>
    %19 = vector.multi_reduction <add>, %18, %cst_7 [0] : vector<2x8x128xf32> to vector<8x128xf32>
    %c0_8 = arith.constant 0 : index
    %c0_9 = arith.constant 0 : index
    %20 = vector.load %arg4[%c0_8, %c0_9] : memref<8x128xf32, #tpu.memory_space<vmem>>, vector<8x128xf32>
    %21 = arith.addf %20, %19 : vector<8x128xf32>
    %c0_10 = arith.constant 0 : index
    %c0_11 = arith.constant 0 : index
    %22 = vector.load %arg4[%c0_10, %c0_11] : memref<8x128xf32, #tpu.memory_space<vmem>>, vector<8x128xf32>
    tpu.vector_store %arg4[%c0_10, %c0_11], %21 {strides = array<i32>} : memref<8x128xf32, #tpu.memory_space<vmem>>, vector<8x128xf32>,
    return
  }
  func.func @transform_0(%arg0: i32, %arg1: i32) -> (i32, i32) {
    %c1_i32 = arith.constant 1 : i32
    %0 = arith.muli %arg0, %c1_i32 : i32
    %1 = arith.addi %0, %arg1 : i32
    %c0_i32 = arith.constant 0 : i32
    %c0_i32_0 = arith.constant 0 : i32
    return %1, %c0_i32 : i32, i32
  }
  func.func @transform_1(%arg0: i32, %arg1: i32) -> (i32, i32) {
    %c1_i32 = arith.constant 1 : i32
    %0 = arith.muli %arg0, %c1_i32 : i32
    %1 = arith.addi %0, %arg1 : i32
    %c0_i32 = arith.constant 0 : i32
    %c0_i32_0 = arith.constant 0 : i32
    return %1, %c0_i32 : i32, i32
  }
  func.func @transform_2(%arg0: i32, %arg1: i32) -> (i32, i32) {
    %c0_i32 = arith.constant 0 : i32
    %c0_i32_0 = arith.constant 0 : i32
    return %arg0, %c0_i32 : i32, i32
  }
}

</mosaic_0001>

<bundles_post_ra>
// kernel: tpu_custom_call.1
= control target key start
LH: loop header
LB: loop body
LE: loop exit
PB: predicated region body
PF: predicated region fallthrough
CT: control target
= control target key end

     0   :  { %v153_v2 = vmov 0   ;;  %s195_s0 = inlined_call_operand.vmem [shape: f32[16,128], index: 0, kind: input, shape index: {}]   ;;  %s196_s1 = inlined_call_operand.vmem [shape: s32[16,1], index: 1, kind: input, shape index: {}]   ;;  %s197_s2 = inlined_call_operand.hbm [shape: f32[8,128], index: 2, kind: output, shape index: {}]  }
   0x1   :  { %v63_v0 = vld [vmem:[%s196_s1] sm:$0xff]  ;;  %v64_v1 = vld [vmem:[%s196_s1 + $0x8] sm:$0xff]  ;;  %128 = vset.pattern.permute.xlu1 %v153_v2  ;;  %127 = vset.pattern.permute.xlu0 %v153_v2 }
   0x2   :  { %vm67_vm0 = vcmp.ne.s32.totalorder %v63_v0, 0  ;;  %vm68_vm1 = vcmp.ne.s32.totalorder %v64_v1, 0 }
   0x3   :  { %7 = vsyncpa [#allocation3], 0  ;;  %82 = vperm.xlu1 %128, %v63_v0   ;;  %v69_v3 = vsel %vm67_vm0, 1, %v153_v2  ;;  %v70_v4 = vsel %vm68_vm1, 1, %v153_v2  ;;  %v65_v5 = vlaneseq  ;;  %v61_v9 = vld [vmem:[%s195_s0] sm:$0xff]  ;;  %v62_v11 = vld [vmem:[%s195_s0 + $0x8] sm:$0xff] }
   0x4   :  { %72 = vperm.xlu0 %127, %v69_v3   ;;  %v154_v12 = vmov 0.0033333334   ;;  %s155_s16 = smov [#allocation2]  }
   0x5   :  { %v66_v6 = vand.u32 127, %v65_v5  ;;  %s103_s17 = sshll.u32 %s155_s16, 4  ;;  %s104_s17 = int_to_ptr.vmem [resolvable:$true] %s103_s17 }
   0x6   :  { %s129_s18 = scalar_lea.vmem %s104_s17, 128  ;;  %p134_p1 = scmp.lt.s32.totalorder %s104_s17, %s104_s17 }
   0x7   :  { %85 = vperm.xlu1 %128, %v64_v1   ;;  %p130_p0 = scmp.ne.s32.totalorder %s104_s17, %s129_s18  ;;  %p135_p2 = scmp.lt.s32.totalorder %s129_s18, %s129_s18 }
   0x8   :  { %75 = vperm.xlu0 %127, %v70_v4  }
   0x9   :  { %p136_p3 = por %p135_p2, %p134_p1 }
   0xb   :  { %p137_p4 = pnand %p136_p3, %p130_p0 }
  0x82   :  { %v83_v7 = vpop.permute.xlu1 %82 }
  0x83   :  { %v73_v8 = vpop.permute.xlu0 %72  ;;  %vm87_vm2 = vcmp.eq.s32.totalorder %v66_v6, %v83_v7 }
  0x84   :  { %vm77_vm3 = vcmp.eq.s32.totalorder %v73_v8, 1  ;;  %v89_v13 = vsel %vm87_vm2, 0.9, %v154_v12 }
  0x85   :  { %v79_v14 = vsel %vm77_vm3, %v61_v9, 0.0 }
  0x86   :  { %v86_v10 = vpop.permute.xlu1 %85  ;;  %v91_v18 = vmul.f32 %v89_v13, %v79_v14 }
  0x87   :  { %vm88_vm4 = vcmp.eq.s32.totalorder %v66_v6, %v86_v10  ;;  %v76_v15 = vpop.permute.xlu0 %75 }
  0x88   :  { %v90_v16 = vsel %vm88_vm4, 0.9, %v154_v12  ;;  %vm78_vm5 = vcmp.eq.s32.totalorder %v76_v15, 1 }
  0x89   :  { %v80_v17 = vsel %vm78_vm5, %v62_v11, 0.0 }
  0x8a   :  { %v92_v19 = vmul.f32 %v90_v16, %v80_v17 }
  0x8c   :  { %v93_v20 = vadd.f32 %v92_v19, %v91_v18 }
  0x8e   :  { %96 = vst [vmem:[#allocation2] sm:$0xff] %v93_v20 }
  0x8f   :  { %140 = shalt.err (!%p137_p4)
}
  0x90   :  { %s141_s20 = scalar_lea.hbm %s197_s2, 128 }
  0x91   :  { %p142_p5 = scmp.ne.s32.totalorder %s197_s2, %s141_s20  ;;  %p145_p6 = scmp.lt.u32.totalorder %s141_s20, %s197_s2 }
  0x93   :  { %p147_p7 = pnand %p145_p6, %p142_p5 }
  0x95   :  { %150 = shalt.err (!%p147_p7)
}
  0x96   :  { %106 = dma.vmem_to_hbm [thread:$0]  %s104_s17, 128, %s197_s2, [#allocation3]  }
  0x97   :  { %151 = dma.done.wait [#allocation3], 128  }
  0x98   :  { %152 = vsyncadd [#allocation3], 4294967168 }
  0x99   :  { %110 = vsyncpa [#allocation3], 1 }

</bundles_post_ra>
